<compile_context>
chip_gen: v6e
topology: v6e:2x2x1
jax: 0.10.0
libtpu: 0.0.40
codegen_flags: <defaults>
</compile_context>

<pallas_src>
import math

import jax
import jax.numpy as jnp
import numpy as np
from jax.experimental import pallas as pl
from jax.experimental.pallas import tpu as pltpu


def _cdiv(a, b):
    return -(-a // b)


# ---------------------------------------------------------------------------
# Kernel bodies
# ---------------------------------------------------------------------------

def _channel_conv_sigmoid(w_ref, m, C, K):
    """K-tap 1-D cross-correlation over channels (axis=1) + sigmoid, in f32.

    m: (TN, C, 1) float32; w_ref: SMEM (K,) float32 taps.  K is tiny (3/5), so a
    static concat + K shifted slices is nanoseconds next to the HBM-bound multiply.
    """
    pad = K // 2
    if pad:
        z = jnp.zeros((m.shape[0], pad, 1), jnp.float32)
        mp = jnp.concatenate([z, m, z], axis=1)          # (TN, C + 2*pad, 1)
    else:
        mp = m
    y = jnp.zeros_like(m)
    for j in range(K):
        y = y + w_ref[j] * mp[:, j:j + C, :]
    return jax.nn.sigmoid(y)                             # (TN, C, 1) f32


def _make_eca_oneshot_kernel(C, K):
    """One grid step sees a full (TN, C, HW) slab: pool + conv + gate + multiply."""

    def kernel(w_ref, x_ref, o_ref):
        xb = x_ref[...]                                                 # (TN, C, HW)
        # Spatial max in the native dtype (exact), cast only the tiny result to f32.
        m = jnp.max(xb, axis=-1, keepdims=True).astype(jnp.float32)     # (TN, C, 1)
        gate = _channel_conv_sigmoid(w_ref, m, C, K)                    # f32
        # Multiply in the native dtype (bf16 stays bf16 on v6e/v7x VALU).
        o_ref[...] = (xb * gate.astype(xb.dtype)).astype(o_ref.dtype)

    return kernel


def _make_eca_gate_kernel(C, K, HW, THW):
    """Pass 1 of the HW-tiled fallback: running max over HW tiles -> sigmoid gate."""

    def kernel(w_ref, x_ref, g_ref, m_sc):
        hw_i = pl.program_id(1)

        @pl.when(hw_i == 0)
        def _():
            m_sc[...] = jnp.full(m_sc.shape, -jnp.inf, m_sc.dtype)

        xb = x_ref[...]                                                  # (TN, C, THW)
        if HW % THW:
            # Mask the ragged HW tail (out-of-bounds block data is garbage).
            lane = jax.lax.broadcasted_iota(jnp.int32, xb.shape, dimension=2)
            xb = jnp.where((hw_i * THW + lane) < HW, xb, -jnp.inf)
        tile_max = jnp.max(xb, axis=-1, keepdims=True).astype(jnp.float32)
        m_sc[...] = jnp.maximum(m_sc[...], tile_max)

        @pl.when(hw_i == pl.num_programs(1) - 1)
        def _():
            g_ref[...] = _channel_conv_sigmoid(w_ref, m_sc[...], C, K)

    return kernel


def _eca_apply_kernel(g_ref, x_ref, o_ref):
    """Pass 2 of the fallback: broadcast-multiply each (TN, C, THW) tile by the gate."""
    xb = x_ref[...]
    o_ref[...] = (xb * g_ref[...].astype(xb.dtype)).astype(o_ref.dtype)


# ---------------------------------------------------------------------------
# Wrapper
# ---------------------------------------------------------------------------

def _tpu_budget():
    """(usable VMEM bytes, num TensorCores) with conservative fallbacks."""
    vmem = 64 << 20            # assume the smallest per-core VMEM (v7x) if query fails
    cores = 1
    try:
        info = pltpu.get_tpu_info()
        vmem = int(getattr(info, "vmem_capacity_bytes", vmem))
        for name in ("num_cores", "num_tensorcores", "tensorcore_count"):
            val = getattr(info, name, None)
            if val:
                cores = int(val)
                break
    except Exception:
        pass
    try:
        d = jax.devices()[0]
        cores = int(getattr(d, "num_cores", cores) or cores)
    except Exception:
        pass
    return vmem, max(1, cores)


def _pick_batch_tile(n, bytes_per_tile, target_bytes, num_cores):
    """Samples per grid step, chosen from the bytes budget (no divisor constraint)."""
    tn = max(1, min(n, target_bytes // max(bytes_per_tile, 1)))
    if num_cores > 1 and n > 1:
        # Keep at least `num_cores` grid steps so every TensorCore has work.
        tn = min(tn, _cdiv(n, num_cores))
        # Prefer a grid length that is a multiple of num_cores if it costs little.
        if _cdiv(n, tn) % num_cores:
            for cand in range(tn, max(tn // 2, 1) - 1, -1):
                if _cdiv(n, cand) % num_cores == 0:
                    tn = cand
                    break
    return max(1, tn)


def efficient_channel_attention(x, w, *, donate_x=False, force_two_pass=False,
                                block_target_bytes=None):
    """ECA forward: out = x * sigmoid(conv1d_K(spatial_max(x))).

    x: (N, C, H, W) float array; w: (K,) Conv1d(1,1,K,bias=False) taps, K odd.
    donate_x=True lets the gated result overwrite x's HBM buffer (only when the
    caller no longer needs x).
    """
    N, C, H, W = x.shape
    K = int(w.shape[0])
    HW = H * W
    itemsize = jnp.dtype(x.dtype).itemsize

    w = w.astype(jnp.float32)               # f32 taps in SMEM regardless of x dtype
    xf = x.reshape(N, C, HW)                # no HBM padding: block last dim == full HW

    vmem_cap, cores = _tpu_budget()
    vmem_cap = max(24 << 20, vmem_cap - (8 << 20))       # leave compiler headroom
    slack = 2 << 20
    if block_target_bytes is None:
        # in + out blocks, each double-buffered -> ~4 live blocks in VMEM.
        block_target = max(2 << 20, min(vmem_cap - slack, 96 << 20) // 5)
    else:
        block_target = int(block_target_bytes)

    bytes_per_sample = C * HW * itemsize
    one_shot_ok = (4 * bytes_per_sample + slack) <= vmem_cap and not force_two_pass

    if one_shot_ok:
        # ---- single-pass kernel: each grid step owns TN full samples ----
        TN = _pick_batch_tile(N, bytes_per_sample, block_target, cores)
        grid = (_cdiv(N, TN),)                           # ragged last block is fine
        block_bytes = TN * bytes_per_sample
        vmem_limit = int(min(vmem_cap, max(32 << 20, 4 * block_bytes + slack)))

        out = pl.pallas_call(
            _make_eca_oneshot_kernel(C, K),
            out_shape=jax.ShapeDtypeStruct((N, C, HW), x.dtype),
            grid_spec=pltpu.PrefetchScalarGridSpec(
                num_scalar_prefetch=1,                   # w -> SMEM
                grid=grid,
                in_specs=[pl.BlockSpec((TN, C, HW), lambda n, w_ref: (n, 0, 0))],
                out_specs=pl.BlockSpec((TN, C, HW), lambda n, w_ref: (n, 0, 0)),
            ),
            compiler_params=pltpu.CompilerParams(
                dimension_semantics=("parallel",),
                vmem_limit_bytes=vmem_limit,
            ),
            input_output_aliases=({1: 0} if donate_x else {}),   # operand 1 is xf
        )(w, xf)
        return out.reshape(N, C, H, W)

    # ---- two-pass HW-tiled fallback (large C*HW slabs, e.g. v7x 64 MiB VMEM) ----
    if HW <= 128:
        THW = HW                                         # full dim -> no lane constraint
    else:
        max_thw = (HW // 128) * 128
        row_bytes = C * 128 * itemsize
        THW = min(max_thw, 128 * max(1, block_target // max(row_bytes, 1)))
    bytes_per_tile = C * THW * itemsize
    TN = _pick_batch_tile(N, bytes_per_tile, block_target, cores)
    grid = (_cdiv(N, TN), _cdiv(HW, THW))
    vmem_limit = int(min(vmem_cap, max(32 << 20, 4 * TN * bytes_per_tile + slack)))

    # Pass 1: running spatial max over HW tiles, gate on the last tile.
    gate = pl.pallas_call(
        _make_eca_gate_kernel(C, K, HW, THW),
        out_shape=jax.ShapeDtypeStruct((N, C, 1), jnp.float32),
        grid_spec=pltpu.PrefetchScalarGridSpec(
            num_scalar_prefetch=1,
            grid=grid,
            in_specs=[pl.BlockSpec((TN, C, THW), lambda n, h, w_ref: (n, 0, h))],
            out_specs=pl.BlockSpec((TN, C, 1), lambda n, h, w_ref: (n, 0, 0)),
            scratch_shapes=[pltpu.VMEM((TN, C, 1), jnp.float32)],
        ),
        compiler_params=pltpu.CompilerParams(
            dimension_semantics=("parallel", "arbitrary"),
            vmem_limit_bytes=vmem_limit,
        ),
    )(w, xf)

    # Pass 2: apply the gate tile by tile.
    out = pl.pallas_call(
        _eca_apply_kernel,
        out_shape=jax.ShapeDtypeStruct((N, C, HW), x.dtype),
        grid=grid,
        in_specs=[pl.BlockSpec((TN, C, 1), lambda n, h: (n, 0, 0)),
                  pl.BlockSpec((TN, C, THW), lambda n, h: (n, 0, h))],
        out_specs=pl.BlockSpec((TN, C, THW), lambda n, h: (n, 0, h)),
        compiler_params=pltpu.CompilerParams(
            dimension_semantics=("parallel", "parallel"),
            vmem_limit_bytes=vmem_limit,
        ),
        input_output_aliases=({1: 0} if donate_x else {}),        # operand 1 is xf
    )(gate, xf)
    return out.reshape(N, C, H, W)


# ---------------------------------------------------------------------------
# Pure-JAX reference and tests
# ---------------------------------------------------------------------------

def eca_reference(x, w):
    """Pure-JAX reference matching the PyTorch forward."""
    N, C, H, W = x.shape
    K = w.shape[0]
    pad = K // 2
    m = jnp.max(x.reshape(N, C, -1), axis=-1)            # (N, C) spatial max
    mp = jnp.pad(m, ((0, 0), (pad, pad)))
    y = jnp.zeros_like(m, dtype=jnp.float32)
    for j in range(K):
        y = y + w[j] * mp[:, j:j + C]
    gate = jax.nn.sigmoid(y)[:, :, None, None]
    return x * gate


if __name__ == "__main__":
    def run_case(N, C, H, W, dtype=jnp.float32, tol=1e-5, **kw):
        # Module hyper-params (match PyTorch __init__): gamma=2, b=1.
        gamma, b = 2, 1
        t = int(abs((math.log(C, 2) + b) / gamma))
        K = t if t % 2 else t + 1
        key = jax.random.PRNGKey(0)
        kx, kw_ = jax.random.split(key)
        x = jax.random.normal(kx, (N, C, H, W), dtype=jnp.float32).astype(dtype)
        bound = 1.0 / math.sqrt(1 * K)                  # Conv1d kaiming-uniform bound
        w = jax.random.uniform(kw_, (K,), dtype=jnp.float32, minval=-bound, maxval=bound)
        out = jax.block_until_ready(efficient_channel_attention(x, w, **kw))
        ref = jax.block_until_ready(eca_reference(x, w))
        np.testing.assert_allclose(np.asarray(out, np.float32),
                                   np.asarray(ref, np.float32), rtol=tol, atol=tol)

    # Primary small case (C=8 -> k=3), HW a multiple of 128.
    run_case(2, 8, 16, 16)
    # Ragged HW (no pad/slice path: block last dim == full HW = 100).
    run_case(3, 8, 10, 10)
    # Ragged batch tile: tiny block budget forces TN=2 over N=3 (cdiv grid).
    run_case(3, 8, 16, 16, block_target_bytes=2 * 8 * 256 * 4)
    # bf16 path: native-dtype max & multiply, f32 conv/sigmoid.
    run_case(2, 8, 16, 16, dtype=jnp.bfloat16, tol=5e-2)
    # In-place gate via HBM aliasing.
    run_case(2, 8, 16, 16, donate_x=True)
    # Two-pass HW-tiled fallback (selected automatically when a (C,HW) slab
    # exceeds the per-core VMEM budget; forced here for coverage).
    run_case(2, 8, 16, 16, force_two_pass=True)
    # Two-pass with a ragged HW tail (HW=400, tile=384 -> masked running max).
    run_case(2, 8, 20, 20, force_two_pass=True)

    print("KERNEL_OK")
</pallas_src>

<mosaic_0001>
module attributes {stable_mosaic.version = 11 : i64} {
  func.func @kernel(%arg0: i32, %arg1: memref<3xf32, #tpu.memory_space<smem>>, %arg2: memref<2x8x256xf32, #tpu.memory_space<vmem>>, %arg3: memref<2x8x256xf32, #tpu.memory_space<vmem>>) attributes {dimension_semantics = [#tpu.dimension_semantics<parallel>], iteration_bounds = array<i64: 1>, scalar_prefetch = 1 : i64, scratch_operands = 0 : i64, tpu.core_type = #tpu.core_type<tc>, window_params = [{transform_indices = @transform_0, window_bounds = array<i64: 2, 8, 256>}, {transform_indices = @transform_1, window_bounds = array<i64: 2, 8, 256>}]} {
    %c0 = arith.constant 0 : index
    %c0_0 = arith.constant 0 : index
    %c0_1 = arith.constant 0 : index
    %0 = vector.load %arg2[%c0, %c0_0, %c0_1] : memref<2x8x256xf32, #tpu.memory_space<vmem>>, vector<2x8x256xf32>
    %cst = arith.constant dense<0xFF800000> : vector<2x8xf32>
    %1 = vector.multi_reduction <maximumf>, %0, %cst [2] : vector<2x8x256xf32> to vector<2x8xf32>
    %2 = vector.shape_cast %1 : vector<2x8xf32> to vector<2x8x1xf32>
    %cst_2 = arith.constant 0.000000e+00 : f32
    %3 = vector.broadcast %cst_2 : f32 to vector<2x1x1xf32>
    %4 = tpu.concatenate %3, %2, %3 in 1 : vector<2x1x1xf32>, vector<2x8x1xf32>, vector<2x1x1xf32> -> vector<2x10x1xf32>
    %cst_3 = arith.constant 0.000000e+00 : f32
    %5 = vector.broadcast %cst_3 : f32 to vector<2x8x1xf32>
    %c0_4 = arith.constant 0 : index
    %6 = memref.load %arg1[%c0_4] : memref<3xf32, #tpu.memory_space<smem>>
    %7 = vector.extract_strided_slice %4 {offsets = [0, 0, 0], sizes = [2, 8, 1], strides = [1, 1, 1]} : vector<2x10x1xf32> to vector<2x8x1xf32>
    %8 = vector.broadcast %6 : f32 to vector<2x8x1xf32>
    %9 = arith.mulf %8, %7 : vector<2x8x1xf32>
    %10 = arith.addf %5, %9 : vector<2x8x1xf32>
    %c1 = arith.constant 1 : index
    %11 = memref.load %arg1[%c1] : memref<3xf32, #tpu.memory_space<smem>>
    %12 = vector.extract_strided_slice %4 {offsets = [0, 1, 0], sizes = [2, 8, 1], strides = [1, 1, 1]} : vector<2x10x1xf32> to vector<2x8x1xf32>
    %13 = vector.broadcast %11 : f32 to vector<2x8x1xf32>
    %14 = arith.mulf %13, %12 : vector<2x8x1xf32>
    %15 = arith.addf %10, %14 : vector<2x8x1xf32>
    %c2 = arith.constant 2 : index
    %16 = memref.load %arg1[%c2] : memref<3xf32, #tpu.memory_space<smem>>
    %17 = vector.extract_strided_slice %4 {offsets = [0, 2, 0], sizes = [2, 8, 1], strides = [1, 1, 1]} : vector<2x10x1xf32> to vector<2x8x1xf32>
    %18 = vector.broadcast %16 : f32 to vector<2x8x1xf32>
    %19 = arith.mulf %18, %17 : vector<2x8x1xf32>
    %20 = arith.addf %15, %19 : vector<2x8x1xf32>
    %21 = arith.negf %20 : vector<2x8x1xf32>
    %22 = math.exp %21 : vector<2x8x1xf32>
    %cst_5 = arith.constant 1.000000e+00 : f32
    %23 = vector.broadcast %cst_5 : f32 to vector<2x8x1xf32>
    %24 = arith.addf %23, %22 : vector<2x8x1xf32>
    %25 = arith.divf %23, %24 : vector<2x8x1xf32>
    %26 = vector.broadcast %25 : vector<2x8x1xf32> to vector<2x8x256xf32>
    %27 = arith.mulf %0, %26 : vector<2x8x256xf32>
    %c0_6 = arith.constant 0 : index
    %c0_7 = arith.constant 0 : index
    %c0_8 = arith.constant 0 : index
    %28 = vector.load %arg3[%c0_6, %c0_7, %c0_8] : memref<2x8x256xf32, #tpu.memory_space<vmem>>, vector<2x8x256xf32>
    tpu.vector_store %arg3[%c0_6, %c0_7, %c0_8], %27 {strides = array<i32>} : memref<2x8x256xf32, #tpu.memory_space<vmem>>, vector<2x8x256xf32>,
    return
  }
  func.func @transform_0(%arg0: i32, %arg1: memref<3xf32, #tpu.memory_space<smem>>) -> (i32, i32, i32) {
    %c0_i32 = arith.constant 0 : i32
    %c0_i32_0 = arith.constant 0 : i32
    %c0_i32_1 = arith.constant 0 : i32
    return %arg0, %c0_i32, %c0_i32_0 : i32, i32, i32
  }
  func.func @transform_1(%arg0: i32, %arg1: memref<3xf32, #tpu.memory_space<smem>>) -> (i32, i32, i32) {
    %c0_i32 = arith.constant 0 : i32
    %c0_i32_0 = arith.constant 0 : i32
    %c0_i32_1 = arith.constant 0 : i32
    return %arg0, %c0_i32, %c0_i32_0 : i32, i32, i32
  }
}

</mosaic_0001>

<bundles_post_ra>
// kernel: tpu_custom_call.1
= control target key start
LH: loop header
LB: loop body
LE: loop exit
PB: predicated region body
PF: predicated region fallthrough
CT: control target
= control target key end

     0   :  { %s218_s9 = smov [#allocation3]   ;;  %s281_s0 = inlined_call_operand.hbm [shape: f32[3], index: 0, kind: input, shape index: {}]   ;;  %s282_s1 = inlined_call_operand.hbm [shape: f32[2,8,256], index: 1, kind: input, shape index: {}]   ;;  %s283_s2 = inlined_call_operand.hbm [shape: f32[2,8,256], index: 2, kind: output, shape index: {}]  }
   0x1   :  { %8 = dma.hbm_to_smem %s281_s0, 16, %s218_s9, [#allocation2] }
   0x2   :  { %212 = dma.done.wait [#allocation2], 16 }
   0x3   :  { %213 = vsyncadd [#allocation2], 4294967280 }
   0x4   :  { %10 = sfence }
   0x5   :  { %11 = vsyncpa [#allocation5], 0 }
   0x6   :  { %12 = vsyncpa [#allocation6], 0  ;;  %s219_s12 = smov [#allocation4]  }
   0x7   :  { %s18_s13 = sshll.u32 %s219_s12, 4  ;;  %s19_s13 = int_to_ptr.vmem [resolvable:$true] %s18_s13 }
   0x8   :  { %s180_s14 = scalar_lea.vmem %s19_s13, 512  ;;  %p185_p1 = scmp.lt.s32.totalorder %s19_s13, %s19_s13 }
   0x9   :  { %p181_p0 = scmp.ne.s32.totalorder %s19_s13, %s180_s14  ;;  %p186_p2 = scmp.lt.s32.totalorder %s180_s14, %s180_s14 }
   0xb   :  { %p187_p3 = por %p186_p2, %p185_p1 }
   0xd   :  { %p188_p4 = pnand %p187_p3, %p181_p0 }
   0xf   :  { %191 = shalt.err (!%p188_p4)
}
  0x10   :  { %s220_s15 = smov 256   ;;  %s221_s16 = smov 16  }
  0x11   :  { %24 = dma.hbm_to_vmem [thread:$0]  %s282_s1, 512, %s19_s13, [#allocation5], %s220_s15, %s220_s15, %s221_s16  }
  0x12   :  { %214 = dma.done.wait [#allocation5], 512  }
  0x13   :  { %215 = vsyncadd [#allocation5], 4294966784  ;;  %v248_v0 = vld [vmem:[#allocation4] sm:$0xff]  ;;  %v250_v1 = vld [vmem:[#allocation4 + $0x8] sm:$0xff]  ;;  %v222_v6 = vmov 0   ;;  %s144_s1 = sld [smem:[#allocation3 + $0x1]] }
  0x14   :  { %v252_v2 = vld [vmem:[#allocation4 + $0x10] sm:$0xff]  ;;  %v32_v3 = vmax.f32 %v248_v0, %v250_v1  ;;  %v256_v4 = vld [vmem:[#allocation4 + $0x18] sm:$0xff]  ;;  %154 = vset.pattern.permute.xlu1 %v222_v6  ;;  %155 = vset.pattern.permute.xlu0 %v222_v6  ;;  %s145_s18 = sld [smem:[#allocation3 + $0x2]]  ;;  %vm44_vm0 = vcmask 1040384   ;;  %vm65_vm1 = vcmask 1046528   ;;  %vm86_vm2 = vcmask 1045504  }
  0x15   :  { %v35_v5 = vmax.f32 %v252_v2, %v256_v4  ;;  %s260_s19 = sld [smem:[#allocation3]]  ;;  %s223_s20 = smov [#allocation7]  }
  0x16   :  { %33 = vmax.xlane.f32.xlu0 %v32_v3  ;;  %s132_s21 = sshll.u32 %s223_s20, 4  ;;  %s133_s21 = int_to_ptr.vmem [resolvable:$true] %s132_s21 }
  0x17   :  { %s192_s22 = scalar_lea.vmem %s133_s21, 512  ;;  %p197_p6 = scmp.lt.s32.totalorder %s133_s21, %s133_s21 }
  0x18   :  { %p193_p5 = scmp.ne.s32.totalorder %s133_s21, %s192_s22  ;;  %p198_p7 = scmp.lt.s32.totalorder %s192_s22, %s192_s22 }
  0x19   :  { %v56_v8 = vstv %s144_s1 }
  0x1a   :  { %36 = vmax.xlane.f32.xlu0 %v35_v5  ;;  %v77_v9 = vstv %s145_s18  ;;  %p199_p8 = por %p198_p7, %p197_p6 }
  0x1b   :  { %v50_v13 = vstv %s260_s19 }
  0x1c   :  { %p200_p9 = pnand %p199_p8, %p193_p5 }
  0x9f   :  { %v34_v7 = vpop.xlane.xlu0 %33 }
  0xa0   :  { %v40_v10 = vrot.slane %v34_v7, 7 }
  0xa2   :  { %v45_v11 = vsel %vm44_vm0, 0.0, %v40_v10  ;;  %v47_v12 = vsel %vm44_vm0, %v40_v10, 0.0 }
  0xa3   :  { %v57_v14 = vmul.f32 %v56_v8, %v45_v11  ;;  %v58_v15 = vmul.f32 %v56_v8, %v47_v12  ;;  %v78_v16 = vmul.f32 %v77_v9, %v45_v11  ;;  %v37_v17 = vpop.xlane.xlu0 %36  ;;  %v79_v18 = vmul.f32 %v77_v9, %v47_v12 }
  0xa4   :  { %v41_v19 = vrot.slane %v37_v17, 7  ;;  %v51_v23 = vmul.f32 %v50_v13, %v45_v11 }
  0xa5   :  { %v66_v20 = vrot.slane %v57_v14, 1  ;;  %v67_v21 = vrot.slane %v58_v15, 1  ;;  %v87_v22 = vrot.slane %v78_v16, 2  ;;  %v88_v24 = vrot.slane %v79_v18, 2 }
  0xa6   :  { %v46_v25 = vsel %vm44_vm0, 0.0, %v41_v19  ;;  %v48_v26 = vsel %vm44_vm0, %v41_v19, 0.0 }
  0xa7   :  { %v68_v27 = vsel %vm65_vm1, %v66_v20, %v67_v21  ;;  %v59_v28 = vmul.f32 %v56_v8, %v46_v25  ;;  %v60_v29 = vmul.f32 %v56_v8, %v48_v26  ;;  %v80_v31 = vmul.f32 %v77_v9, %v46_v25 }
  0xa8   :  { %v74_v30 = vadd.f32 %v68_v27, %v51_v23  ;;  %v81_v32 = vmul.f32 %v77_v9, %v48_v26  ;;  %v89_v33 = vsel %vm86_vm2, %v87_v22, %v88_v24  ;;  %v52_v37 = vmul.f32 %v50_v13, %v46_v25 }
  0xa9   :  { %v69_v34 = vrot.slane %v59_v28, 1  ;;  %v70_v35 = vrot.slane %v60_v29, 1  ;;  %v90_v38 = vrot.slane %v80_v31, 2 }
  0xaa   :  { %v95_v36 = vadd.f32 %v89_v33, %v74_v30  ;;  %v91_v39 = vrot.slane %v81_v32, 2 }
  0xab   :  { %v71_v40 = vsel %vm65_vm1, %v69_v34, %v70_v35 }
  0xac   :  { %v146_v41 = vmul.f32 -1.442695, %v95_v36  ;;  %v75_v42 = vadd.f32 %v71_v40, %v52_v37  ;;  %v92_v43 = vsel %vm86_vm2, %v90_v38, %v91_v39 }
  0xae   :  { %156 = vpow2.f32 %v146_v41  ;;  %v96_v44 = vadd.f32 %v92_v43, %v75_v42 }
  0xb0   :  { %v147_v45 = vmul.f32 -1.442695, %v96_v44 }
  0xb2   :  { %158 = vpow2.f32 %v147_v45 }
  0xbb   :  { %v157_v46 = vpop.eup %156 }
  0xbc   :  { %v103_v47 = vadd.f32 1.0, %v157_v46 }
  0xbe   :  { %160 = vrcp.f32 %v103_v47 }
  0xbf   :  { %v159_v48 = vpop.eup %158 }
  0xc0   :  { %v104_v49 = vadd.f32 1.0, %v159_v48 }
  0xc2   :  { %162 = vrcp.f32 %v104_v49 }
  0xcb   :  { %v161_v50 = vpop.eup %160 }
  0xcc   :  { %111 = vperm.xlu1 %154, %v161_v50  }
  0xcf   :  { %v163_v51 = vpop.eup %162 }
  0xd0   :  { %116 = vperm.xlu1 %154, %v163_v51  }
 0x147   :  { %v112_v52 = vpop.permute.xlu1 %111 }
 0x148   :  { %v119_v53 = vmul.f32 %v112_v52, %v248_v0  ;;  %v120_v54 = vmul.f32 %v112_v52, %v250_v1 }
 0x14a   :  { %123 = vst [vmem:[#allocation7] sm:$0xff] %v119_v53  ;;  %124 = vst [vmem:[#allocation7 + $0x8] sm:$0xff] %v120_v54 }
 0x14b   :  { %v117_v55 = vpop.permute.xlu1 %116 }
 0x14c   :  { %v121_v56 = vmul.f32 %v117_v55, %v252_v2  ;;  %v122_v57 = vmul.f32 %v117_v55, %v256_v4 }
 0x14e   :  { %125 = vst [vmem:[#allocation7 + $0x10] sm:$0xff] %v121_v56  ;;  %126 = vst [vmem:[#allocation7 + $0x18] sm:$0xff] %v122_v57 }
 0x14f   :  { %203 = shalt.err (!%p200_p9)
}
 0x150   :  { %138 = dma.vmem_to_hbm [thread:$0]  %s133_s21, 512, %s283_s2, [#allocation6], %s220_s15, %s220_s15, %s221_s16  }
 0x151   :  { %216 = dma.done.wait [#allocation6], 512  }
 0x152   :  { %217 = vsyncadd [#allocation6], 4294966784 }
 0x153   :  { %142 = vsyncpa [#allocation5], 1 }
 0x154   :  { %143 = vsyncpa [#allocation6], 1 }

</bundles_post_ra>
